<compile_context>
chip_gen: v7x
topology: tpu7x:2x2x1
jax: 0.10.0
libtpu: 0.0.40
codegen_flags: <defaults>
</compile_context>

<pallas_src>
import functools

import jax
import jax.numpy as jnp
from jax import lax
from jax.experimental import pallas as pl
from jax.experimental.pallas import tpu as pltpu


def _round_up(x, m):
    return (x + m - 1) // m * m


def mlp_kernel(x_ref, w1_ref, b1_ref, w2_ref, b2_ref, w3_ref, b3_ref, o_ref,
               *, sub_b, n_sub, unroll):
    """One batch tile: three fused matmuls, f32 MXU accumulate, f32 epilogue."""
    # Resident weights / biases (constant index_map) -> loaded once per step.
    w1 = w1_ref[...]
    w2 = w2_ref[...]
    w3 = w3_ref[...]
    b1 = b1_ref[...]
    b2 = b2_ref[...]
    b3 = b3_ref[...]
    cdt = w1.dtype  # MXU operand dtype (bf16 or f32)

    def sub_chunk(x_blk):
        # cast x on the VPU inside the kernel (input stays native dtype in HBM)
        h1 = jnp.dot(x_blk.astype(cdt), w1, preferred_element_type=jnp.float32)
        h1 = jnp.maximum(h1 + b1, 0.0)                       # f32 bias + ReLU
        h2 = jnp.dot(h1.astype(cdt), w2, preferred_element_type=jnp.float32)
        h2 = jnp.maximum(h2 + b2, 0.0)
        y = jnp.dot(h2.astype(cdt), w3, preferred_element_type=jnp.float32)
        return (y + b3).astype(o_ref.dtype)

    if n_sub == 1:
        o_ref[...] = sub_chunk(x_ref[...])
    else:
        # Big tile for DMA, small tile for compute: keep intermediates in vregs.
        def body(s, carry):
            r = pl.multiple_of(s * sub_b, sub_b)
            o_ref[pl.ds(r, sub_b), :] = sub_chunk(x_ref[pl.ds(r, sub_b), :])
            return carry

        lax.fori_loop(0, n_sub, body, 0, unroll=unroll)


@functools.partial(jax.jit, static_argnames=("block_b", "compute_dtype"))
def mlp_forward(x, params, block_b=1024, compute_dtype=jnp.bfloat16):
    """x: (B, ...) -> (B, num_classes). Flatten in wrapper, everything else in-kernel."""
    orig_dtype = x.dtype
    b = x.shape[0]
    if x.ndim > 2:
        x = x.reshape(b, -1)                      # matches torch x.view(x.size(0), -1)
    w1, b1, w2, b2, w3, b3 = params
    in_dim, h1_dim = w1.shape
    h2_dim = w2.shape[1]
    n_cls = w3.shape[1]
    assert x.shape[1] == in_dim

    # ---- weights/biases: small (~0.3 MiB), cast once; x stays native dtype ----
    f32 = jnp.float32
    w1c = w1.astype(compute_dtype)
    w2c = w2.astype(compute_dtype)
    w3c = w3.astype(compute_dtype)
    b1c = b1.astype(f32)
    b2c = b2.astype(f32)
    b3c = b3.astype(f32)

    # ---- batch tiling: large tile, ragged tail clipped by Pallas ----
    x_itemsize = jnp.dtype(x.dtype).itemsize
    # VMEM-safe cap (tightest on v7x: 32 MiB default scoped / 64 MiB physical)
    max_tile = 2048 if x_itemsize >= 4 else 4096
    block_b = _round_up(max(8, min(block_b, max_tile)), 8)
    if b <= 8:
        block_b_eff = b                           # single block == full array dim
    else:
        # keep >= 2 grid steps so v7x's two TensorCores both get work
        half_b = _round_up(max((b + 1) // 2, 8), 8)
        block_b_eff = min(block_b, half_b)
    grid = (pl.cdiv(b, block_b_eff),)

    # in-kernel sub-chunk size (keeps h1/h2 in the vreg file)
    if block_b_eff % 128 == 0:
        sub_b = 128
    elif block_b_eff % 64 == 0:
        sub_b = 64
    else:
        sub_b = block_b_eff
    n_sub = block_b_eff // sub_b
    unroll = True if n_sub <= 4 else 2            # bound unroll: avoid vreg spills

    flops = 2 * b * (in_dim * h1_dim + h1_dim * h2_dim + h2_dim * n_cls)
    bytes_accessed = (
        b * in_dim * x_itemsize                                   # x read (native dtype)
        + (w1c.size + w2c.size + w3c.size) * jnp.dtype(compute_dtype).itemsize
        + (b1c.size + b2c.size + b3c.size) * 4
        + b * n_cls * jnp.dtype(orig_dtype).itemsize              # narrow output
    )

    kernel = functools.partial(mlp_kernel, sub_b=sub_b, n_sub=n_sub, unroll=unroll)

    def x_map(i):
        return (i, 0)

    def rep_map(i):
        return (0, 0)

    out = pl.pallas_call(
        kernel,
        out_shape=jax.ShapeDtypeStruct((b, n_cls), orig_dtype),
        grid_spec=pltpu.PrefetchScalarGridSpec(
            num_scalar_prefetch=0,
            grid=grid,
            in_specs=[
                pl.BlockSpec((block_b_eff, in_dim), x_map),   # x tile (native dtype)
                pl.BlockSpec(w1c.shape, rep_map),             # W1 (resident)
                pl.BlockSpec(b1c.shape, rep_map),             # b1
                pl.BlockSpec(w2c.shape, rep_map),             # W2
                pl.BlockSpec(b2c.shape, rep_map),             # b2
                pl.BlockSpec(w3c.shape, rep_map),             # W3
                pl.BlockSpec(b3c.shape, rep_map),             # b3
            ],
            out_specs=pl.BlockSpec((block_b_eff, n_cls), x_map),   # narrow output
        ),
        compiler_params=pltpu.CompilerParams(
            dimension_semantics=("parallel",),      # shards grid over v7x's 2 TCs
            vmem_limit_bytes=32 * 1024 * 1024,      # raise v5e's 16 MiB default
        ),
        cost_estimate=pl.CostEstimate(
            flops=flops, transcendentals=0, bytes_accessed=bytes_accessed),
    )(x, w1c, b1c, w2c, b2c, w3c, b3c)

    return out


def init_params(key, input_dim=784, hidden_dims=(128, 64), num_classes=10,
                dtype=jnp.float32):
    """Deterministic init mimicking nn.Linear (uniform(-1/sqrt(fan_in), 1/sqrt(fan_in)))."""
    dims = [input_dim] + list(hidden_dims) + [num_classes]
    params = []
    for d_in, d_out in zip(dims[:-1], dims[1:]):
        key, kw, kb = jax.random.split(key, 3)
        bound = 1.0 / jnp.sqrt(d_in)
        w = jax.random.uniform(kw, (d_in, d_out), dtype, -bound, bound)
        bias = jax.random.uniform(kb, (1, d_out), dtype, -bound, bound)
        params.extend([w, bias])
    return tuple(params)


def mlp_reference(x, params, compute_dtype=jnp.float32):
    """Pure-JAX reference (emulates the kernel's operand rounding for bf16)."""
    if x.ndim > 2:
        x = x.reshape(x.shape[0], -1)
    w1, b1, w2, b2, w3, b3 = params
    f32 = jnp.float32
    x = x.astype(compute_dtype).astype(f32)
    w1 = w1.astype(compute_dtype).astype(f32)
    w2 = w2.astype(compute_dtype).astype(f32)
    w3 = w3.astype(compute_dtype).astype(f32)
    h1 = jnp.maximum(x @ w1 + b1, 0.0)
    h1 = h1.astype(compute_dtype).astype(f32)
    h2 = jnp.maximum(h1 @ w2 + b2, 0.0)
    h2 = h2.astype(compute_dtype).astype(f32)
    return h2 @ w3 + b3


if __name__ == "__main__":
    key = jax.random.PRNGKey(0)
    key, kx1, kx2 = jax.random.split(key, 3)
    params = init_params(key)

    # Test 1: NCHW MNIST-like input, default path (bf16 MXU operands),
    #         2-step grid (block_b_eff capped at ceil(b/2)).
    x1 = jax.random.normal(kx1, (32, 1, 28, 28), jnp.float32)
    out1 = jax.block_until_ready(mlp_forward(x1, params))
    ref1 = mlp_reference(x1, params, compute_dtype=jnp.bfloat16)
    assert out1.shape == (32, 10), out1.shape
    assert jnp.allclose(out1, ref1, atol=1e-2, rtol=1e-2), "bf16 path mismatch vs reference"

    # Test 2: 2-D input, ragged batch (exercises the clipped partial last block),
    #         f32 MXU operands.
    x2 = jax.random.normal(kx2, (19, 784), jnp.float32)
    out2 = jax.block_until_ready(
        mlp_forward(x2, params, block_b=1024, compute_dtype=jnp.float32))
    ref2 = mlp_reference(x2, params, compute_dtype=jnp.float32)
    assert out2.shape == (19, 10), out2.shape
    assert jnp.allclose(out2, ref2, atol=1e-2, rtol=1e-2), "f32 path mismatch vs reference"

    print("KERNEL_OK")
</pallas_src>

<mosaic_0001>
module attributes {stable_mosaic.version = 11 : i64} {
  func.func @mlp_kernel(%arg0: i32, %arg1: memref<16x784xf32, #tpu.memory_space<vmem>>, %arg2: memref<784x128xbf16, #tpu.memory_space<vmem>>, %arg3: memref<1x128xf32, #tpu.memory_space<vmem>>, %arg4: memref<128x64xbf16, #tpu.memory_space<vmem>>, %arg5: memref<1x64xf32, #tpu.memory_space<vmem>>, %arg6: memref<64x10xbf16, #tpu.memory_space<vmem>>, %arg7: memref<1x10xf32, #tpu.memory_space<vmem>>, %arg8: memref<16x10xf32, #tpu.memory_space<vmem>>) attributes {dimension_semantics = [#tpu.dimension_semantics<parallel>], iteration_bounds = array<i64: 2>, scalar_prefetch = 0 : i64, scratch_operands = 0 : i64, tpu.core_type = #tpu.core_type<tc>, window_params = [{transform_indices = @transform_0, window_bounds = array<i64: 16, 784>}, {pipeline_mode = #tpu.pipeline_mode<synchronous>, transform_indices = @transform_1, window_bounds = array<i64: 784, 128>}, {pipeline_mode = #tpu.pipeline_mode<synchronous>, transform_indices = @transform_2, window_bounds = array<i64: 1, 128>}, {pipeline_mode = #tpu.pipeline_mode<synchronous>, transform_indices = @transform_3, window_bounds = array<i64: 128, 64>}, {pipeline_mode = #tpu.pipeline_mode<synchronous>, transform_indices = @transform_4, window_bounds = array<i64: 1, 64>}, {pipeline_mode = #tpu.pipeline_mode<synchronous>, transform_indices = @transform_5, window_bounds = array<i64: 64, 10>}, {pipeline_mode = #tpu.pipeline_mode<synchronous>, transform_indices = @transform_6, window_bounds = array<i64: 1, 10>}, {transform_indices = @transform_7, window_bounds = array<i64: 16, 10>}]} {
    %c0 = arith.constant 0 : index
    %c0_0 = arith.constant 0 : index
    %0 = vector.load %arg2[%c0, %c0_0] : memref<784x128xbf16, #tpu.memory_space<vmem>>, vector<784x128xbf16>
    %c0_1 = arith.constant 0 : index
    %c0_2 = arith.constant 0 : index
    %1 = vector.load %arg4[%c0_1, %c0_2] : memref<128x64xbf16, #tpu.memory_space<vmem>>, vector<128x64xbf16>
    %c0_3 = arith.constant 0 : index
    %c0_4 = arith.constant 0 : index
    %2 = vector.load %arg6[%c0_3, %c0_4] : memref<64x10xbf16, #tpu.memory_space<vmem>>, vector<64x10xbf16>
    %c0_5 = arith.constant 0 : index
    %c0_6 = arith.constant 0 : index
    %3 = vector.load %arg3[%c0_5, %c0_6] : memref<1x128xf32, #tpu.memory_space<vmem>>, vector<1x128xf32>
    %c0_7 = arith.constant 0 : index
    %c0_8 = arith.constant 0 : index
    %4 = vector.load %arg5[%c0_7, %c0_8] : memref<1x64xf32, #tpu.memory_space<vmem>>, vector<1x64xf32>
    %c0_9 = arith.constant 0 : index
    %c0_10 = arith.constant 0 : index
    %5 = vector.load %arg7[%c0_9, %c0_10] : memref<1x10xf32, #tpu.memory_space<vmem>>, vector<1x10xf32>
    %c0_11 = arith.constant 0 : index
    %c0_12 = arith.constant 0 : index
    %6 = vector.load %arg1[%c0_11, %c0_12] : memref<16x784xf32, #tpu.memory_space<vmem>>, vector<16x784xf32>
    %7 = arith.truncf %6 : vector<16x784xf32> to vector<16x784xbf16>
    %cst = arith.constant dense<0.000000e+00> : vector<16x128xf32>
    %8 = tpu.matmul %7, %0, %cst {dimension_numbers = #tpu.dot_dimension_numbers<[1], [0], [0], [1], [0, 0, 1, 1], [], []>} : vector<16x784xbf16>, vector<784x128xbf16>, vector<16x128xf32> -> vector<16x128xf32>
    %9 = vector.broadcast %3 : vector<1x128xf32> to vector<16x128xf32>
    %10 = arith.addf %8, %9 : vector<16x128xf32>
    %cst_13 = arith.constant 0.000000e+00 : f32
    %11 = vector.broadcast %cst_13 : f32 to vector<16x128xf32>
    %12 = arith.maximumf %10, %11 : vector<16x128xf32>
    %13 = arith.truncf %12 : vector<16x128xf32> to vector<16x128xbf16>
    %cst_14 = arith.constant dense<0.000000e+00> : vector<16x64xf32>
    %14 = tpu.matmul %13, %1, %cst_14 {dimension_numbers = #tpu.dot_dimension_numbers<[1], [0], [0], [1], [0, 0, 1, 1], [], []>} : vector<16x128xbf16>, vector<128x64xbf16>, vector<16x64xf32> -> vector<16x64xf32>
    %15 = vector.broadcast %4 : vector<1x64xf32> to vector<16x64xf32>
    %16 = arith.addf %14, %15 : vector<16x64xf32>
    %cst_15 = arith.constant 0.000000e+00 : f32
    %17 = vector.broadcast %cst_15 : f32 to vector<16x64xf32>
    %18 = arith.maximumf %16, %17 : vector<16x64xf32>
    %19 = arith.truncf %18 : vector<16x64xf32> to vector<16x64xbf16>
    %cst_16 = arith.constant dense<0.000000e+00> : vector<16x10xf32>
    %20 = tpu.matmul %19, %2, %cst_16 {dimension_numbers = #tpu.dot_dimension_numbers<[1], [0], [0], [1], [0, 0, 1, 1], [], []>} : vector<16x64xbf16>, vector<64x10xbf16>, vector<16x10xf32> -> vector<16x10xf32>
    %21 = vector.broadcast %5 : vector<1x10xf32> to vector<16x10xf32>
    %22 = arith.addf %20, %21 : vector<16x10xf32>
    %c0_17 = arith.constant 0 : index
    %c0_18 = arith.constant 0 : index
    %23 = vector.load %arg8[%c0_17, %c0_18] : memref<16x10xf32, #tpu.memory_space<vmem>>, vector<16x10xf32>
    tpu.vector_store %arg8[%c0_17, %c0_18], %22 {strides = array<i32>} : memref<16x10xf32, #tpu.memory_space<vmem>>, vector<16x10xf32>,
    return
  }
  func.func @transform_0(%arg0: i32) -> (i32, i32) {
    %c0_i32 = arith.constant 0 : i32
    %c0_i32_0 = arith.constant 0 : i32
    return %arg0, %c0_i32 : i32, i32
  }
  func.func @transform_1(%arg0: i32) -> (i32, i32) {
    %c0_i32 = arith.constant 0 : i32
    %c0_i32_0 = arith.constant 0 : i32
    %c0_i32_1 = arith.constant 0 : i32
    return %c0_i32, %c0_i32_0 : i32, i32
  }
  func.func @transform_2(%arg0: i32) -> (i32, i32) {
    %c0_i32 = arith.constant 0 : i32
    %c0_i32_0 = arith.constant 0 : i32
    %c0_i32_1 = arith.constant 0 : i32
    return %c0_i32, %c0_i32_0 : i32, i32
  }
  func.func @transform_3(%arg0: i32) -> (i32, i32) {
    %c0_i32 = arith.constant 0 : i32
    %c0_i32_0 = arith.constant 0 : i32
    %c0_i32_1 = arith.constant 0 : i32
    return %c0_i32, %c0_i32_0 : i32, i32
  }
  func.func @transform_4(%arg0: i32) -> (i32, i32) {
    %c0_i32 = arith.constant 0 : i32
    %c0_i32_0 = arith.constant 0 : i32
    %c0_i32_1 = arith.constant 0 : i32
    return %c0_i32, %c0_i32_0 : i32, i32
  }
  func.func @transform_5(%arg0: i32) -> (i32, i32) {
    %c0_i32 = arith.constant 0 : i32
    %c0_i32_0 = arith.constant 0 : i32
    %c0_i32_1 = arith.constant 0 : i32
    return %c0_i32, %c0_i32_0 : i32, i32
  }
  func.func @transform_6(%arg0: i32) -> (i32, i32) {
    %c0_i32 = arith.constant 0 : i32
    %c0_i32_0 = arith.constant 0 : i32
    %c0_i32_1 = arith.constant 0 : i32
    return %c0_i32, %c0_i32_0 : i32, i32
  }
  func.func @transform_7(%arg0: i32) -> (i32, i32) {
    %c0_i32 = arith.constant 0 : i32
    %c0_i32_0 = arith.constant 0 : i32
    return %arg0, %c0_i32 : i32, i32
  }
}

</mosaic_0001>

<bundles_post_ra>
// kernel: mlp_forward.1
= control target key start
LH: loop header
LB: loop body
LE: loop exit
PB: predicated region body
PF: predicated region fallthrough
CT: control target
= control target key end

     0   :  { %s1454_s24 = smov 0   ;;  %s1704_s0 = inlined_call_operand.vmem [shape: f32[32,784], index: 0, kind: input, shape index: {}]   ;;  %s1705_s1 = inlined_call_operand.vmem [shape: bf16[784,128], index: 1, kind: input, shape index: {}]   ;;  %s1706_s2 = inlined_call_operand.vmem [shape: f32[1,128], index: 2, kind: input, shape index: {}]   ;;  %s1707_s3 = inlined_call_operand.vmem [shape: bf16[128,64], index: 3, kind: input, shape index: {}]   ;;  %s1708_s4 = inlined_call_operand.vmem [shape: f32[1,64], index: 4, kind: input, shape index: {}]   ;;  %s1709_s5 = inlined_call_operand.vmem [shape: bf16[64,10], index: 5, kind: input, shape index: {}]   ;;  %s1710_s6 = inlined_call_operand.vmem [shape: f32[1,10], index: 6, kind: input, shape index: {}]   ;;  %s1711_s7 = inlined_call_operand.vmem [shape: f32[32,10], index: 7, kind: output, shape index: {}]  }
   0x1 LB: > { %s1135_s25 = sadd.s32 4294967295, %s1410_s24   ;;  %p1139_p0 = scmp.ge.s32.totalorder %s1410_s24, 1  ;;  %s1410_s24 = sphi %s1454_s24, %s17_s24  }
   0x2   : > { %p239_p1 = scmp.lt.s32.totalorder %s1410_s24, 3 }
   0x4   : > { %p240_p2 = pnand %p1139_p0, %p239_p1 }
   0x5   : > { %v1343_v0 = vld [vmem:[%s1705_s1 + $0x40] sm:$0xff] (!%p240_p2)   ;;  %v1347_v4 = vld [vmem:[%s1705_s1 + $0x48] sm:$0xff] (!%p240_p2)   ;;  %v1351_v8 = vld [vmem:[%s1705_s1 + $0x50] sm:$0xff] (!%p240_p2)   ;;  %s1140_s10 = sshll.u32 (!%p240_p2), %s1135_s25, 1  ;;  %v1412_v43 = vmov (!%p240_p2), 0.0   ;;  %vm1413_vm0 = vmmov (!%p240_p2), 0  }
   0x6   : > { %243 = sbr.rel (%p240_p2) target bundleno = 732 (0x2dc), region = 48  ;;  %v1344_v1 = vld [vmem:[%s1705_s1] sm:$0xff] (!%p240_p2)   ;;  %1212 = vmatprep.subr.bf16.mxu0 (!%p240_p2), %v1343_v0  ;;  %v1348_v5 = vld [vmem:[%s1705_s1 + $0x8] sm:$0xff] (!%p240_p2)   ;;  %v1352_v9 = vld [vmem:[%s1705_s1 + $0x10] sm:$0xff] (!%p240_p2)   ;;  %p273_p3 = scmp.lt.s32.totalorder (!%p240_p2), %s1140_s10, 3  ;;  %vm732_vm1 = vcmask (!%p240_p2), 130048  }
   0x7   : > { %v1345_v2 = vld [vmem:[%s1705_s1 + $0xc0] sm:$0xff] (!%p240_p2)   ;;  %1213 = vmatpush3.bf16.msra.mxu0 (!%p240_p2), %v1344_v1  ;;  %v1349_v6 = vld [vmem:[%s1705_s1 + $0xc8] sm:$0xff] (!%p240_p2)   ;;  %v1353_v10 = vld [vmem:[%s1705_s1 + $0xd0] sm:$0xff] (!%p240_p2)   ;;  %vm1031_vm2 = vcmask (!%p240_p2), 523264   ;;  %vm1076_vm3 = vcmask (!%p240_p2), 80896  }
   0x8   : > { %v1346_v3 = vld [vmem:[%s1705_s1 + $0x80] sm:$0xff] (!%p240_p2)   ;;  %1234 = vmatprep.subr.bf16.mxu1 (!%p240_p2), %v1345_v2  ;;  %1214 = vmatprep.subr.bf16.mxu0 (!%p240_p2), %v1347_v4  ;;  %v1350_v7 = vld [vmem:[%s1705_s1 + $0x88] sm:$0xff] (!%p240_p2)   ;;  %v1354_v11 = vld [vmem:[%s1705_s1 + $0x90] sm:$0xff] (!%p240_p2)  }
   0x9   : > { %1235 = vmatpush3.bf16.msra.mxu1 (!%p240_p2), %v1346_v3  ;;  %v1355_v12 = vld [vmem:[%s1705_s1 + $0x58] sm:$0xff] (!%p240_p2)   ;;  %v1359_v16 = vld [vmem:[%s1705_s1 + $0x60] sm:$0xff] (!%p240_p2)   ;;  %v1363_v20 = vld [vmem:[%s1705_s1 + $0x68] sm:$0xff] (!%p240_p2)  }
   0xa   : > { %1236 = vmatprep.subr.bf16.mxu1 (!%p240_p2), %v1349_v6  ;;  %v1356_v13 = vld [vmem:[%s1705_s1 + $0x18] sm:$0xff] (!%p240_p2)   ;;  %v1360_v17 = vld [vmem:[%s1705_s1 + $0x20] sm:$0xff] (!%p240_p2)   ;;  %v1364_v21 = vld [vmem:[%s1705_s1 + $0x28] sm:$0xff] (!%p240_p2)  }
   0xb   : > { %1215 = vmatpush3.bf16.msra.mxu0 (!%p240_p2), %v1348_v5  ;;  %v1357_v14 = vld [vmem:[%s1705_s1 + $0xd8] sm:$0xff] (!%p240_p2)   ;;  %v1361_v18 = vld [vmem:[%s1705_s1 + $0xe0] sm:$0xff] (!%p240_p2)   ;;  %v1365_v22 = vld [vmem:[%s1705_s1 + $0xe8] sm:$0xff] (!%p240_p2)  }
   0xc   : > { %1216 = vmatprep.subr.bf16.mxu0 (!%p240_p2), %v1351_v8  ;;  %v1358_v15 = vld [vmem:[%s1705_s1 + $0x98] sm:$0xff] (!%p240_p2)   ;;  %v1362_v19 = vld [vmem:[%s1705_s1 + $0xa0] sm:$0xff] (!%p240_p2)   ;;  %v1366_v23 = vld [vmem:[%s1705_s1 + $0xa8] sm:$0xff] (!%p240_p2)  }
   0xd   : > { %1237 = vmatpush3.bf16.msra.mxu1 %v1350_v7  ;;  %s1713_s10 = smov (!%p273_p3, %s1140_s10), 3  ;;  %v1367_v24 = vld [vmem:[%s1705_s1 + $0x70] sm:$0xff]   ;;  %v1371_v28 = vld [vmem:[%s1705_s1 + $0x78] sm:$0xff]   ;;  %v1375_v38 = vld [vmem:[%s1705_s1 + $0x140] sm:$0xff]  }
   0xe   : > { %1238 = vmatprep.subr.bf16.mxu1 %v1353_v10  ;;  %s1332_s12 = smul.u32 56, %s1713_s10  ;;  %v1368_v25 = vld [vmem:[%s1705_s1 + $0x30] sm:$0xff]   ;;  %v1372_v29 = vld [vmem:[%s1705_s1 + $0x38] sm:$0xff]   ;;  %v1376_v42 = vld [vmem:[%s1705_s1 + $0x100] sm:$0xff]   ;;  %s1143_s8 = sshll.u32 %s1713_s10, 3 }
   0xf   : > { %1217 = vmatpush3.bf16.msra.mxu0 %v1352_v9  ;;  %v1369_v26 = vld [vmem:[%s1705_s1 + $0xf0] sm:$0xff]   ;;  %v1373_v30 = vld [vmem:[%s1705_s1 + $0xf8] sm:$0xff]   ;;  %v1377_v47 = vld [vmem:[%s1705_s1 + $0x148] sm:$0xff]   ;;  %s283_s14 = scalar_lea.vmem %s1711_s7, %s1143_s8 }
  0x10   : > { %1218 = vmatprep.subr.bf16.mxu0 %v1355_v12  ;;  %v1370_v27 = vld [vmem:[%s1705_s1 + $0xb0] sm:$0xff]   ;;  %s1557_s22 = scalar_lea.vmem %s1704_s0, %s1332_s12  ;;  %v1374_v34 = vld [vmem:[%s1705_s1 + $0xb8] sm:$0xff]   ;;  %v1378_v48 = vld [vmem:[%s1705_s1 + $0x108] sm:$0xff]  }
  0x11   : > { %1239 = vmatpush3.bf16.msra.mxu1 %v1354_v11  ;;  %v412_v31 = vld [vmem:[%s1557_s22 + $0x8] sm:$0xff]  ;;  %v419_v32 = vld [vmem:[%s1557_s22 + $0x40] sm:$0xff]  ;;  %v418_v36 = vld [vmem:[%s1557_s22 + $0x38] sm:$0xff] }
  0x12   : > { %1240 = vmatprep.subr.bf16.mxu1 %v1357_v14  ;;  %v426_v33 = vpack.c.bf16 %v419_v32, %v412_v31  ;;  %v411_v35 = vld [vmem:[%s1557_s22] sm:$0xff]  ;;  %v414_v39 = vld [vmem:[%s1557_s22 + $0x18] sm:$0xff]  ;;  %v421_v40 = vld [vmem:[%s1557_s22 + $0x50] sm:$0xff] }
  0x13   : > { %1219 = vmatpush3.bf16.msra.mxu0 %v1356_v13  ;;  %v425_v37 = vpack.c.bf16 %v418_v36, %v411_v35  ;;  %v428_v41 = vpack.c.bf16 %v421_v40, %v414_v39  ;;  %v413_v44 = vld [vmem:[%s1557_s22 + $0x10] sm:$0xff]  ;;  %v420_v45 = vld [vmem:[%s1557_s22 + $0x48] sm:$0xff]  ;;  %v1381_v51 = vld [vmem:[%s1705_s1 + $0x158] sm:$0xff]  }
  0x14   : > { %1220 = vmatprep.subr.bf16.mxu0 %v1359_v16  ;;  %768 = vmatprep.mubr.bf16.mxu0 %v426_v33  ;;  %v427_v46 = vpack.c.bf16 %v420_v45, %v413_v44  ;;  %v1379_v49 = vld [vmem:[%s1705_s1 + $0x150] sm:$0xff]   ;;  %v1382_v52 = vld [vmem:[%s1705_s1 + $0x118] sm:$0xff]   ;;  %v1383_v53 = vld [vmem:[%s1705_s1 + $0x160] sm:$0xff]  }
  0x15   : > { %1241 = vmatpush3.bf16.msra.mxu1 %v1358_v15  ;;  %809 = vmatprep.mubr.bf16.mxu1 %v428_v41  ;;  %v1380_v50 = vld [vmem:[%s1705_s1 + $0x110] sm:$0xff]   ;;  %v1384_v54 = vld [vmem:[%s1705_s1 + $0x120] sm:$0xff]   ;;  %v1385_v55 = vld [vmem:[%s1705_s1 + $0x168] sm:$0xff]  }
  0x16   : > { %1242 = vmatprep.subr.bf16.mxu1 %v1361_v18  ;;  %v1391_v56 = vld [vmem:[%s1705_s1 + $0x180] sm:$0xff]   ;;  %v416_v57 = vld [vmem:[%s1557_s22 + $0x28] sm:$0xff]  ;;  %v1387_v59 = vld [vmem:[%s1705_s1 + $0x170] sm:$0xff]  }
  0x17   : > { %1221 = vmatpush3.bf16.msra.mxu0 %v1360_v17  ;;  %v1386_v58 = vld [vmem:[%s1705_s1 + $0x128] sm:$0xff]   ;;  %v423_v60 = vld [vmem:[%s1557_s22 + $0x60] sm:$0xff]  ;;  %v417_v62 = vld [vmem:[%s1557_s22 + $0x30] sm:$0xff] }
  0x18   : > { %1222 = vmatprep.subr.bf16.mxu0 %v1363_v20  ;;  %v430_v61 = vpack.c.bf16 %v423_v60, %v416_v57  ;;  %v424_v63 = vld [vmem:[%s1557_s22 + $0x68] sm:$0xff]  ;;  %v1388_v1 = vld [vmem:[%s1705_s1 + $0x130] sm:$0xff]   ;;  %v1389_v2 = vld [vmem:[%s1705_s1 + $0x178] sm:$0xff]  }
  0x19   : > { %1243 = vmatpush3.bf16.msra.mxu1 %v1362_v19  ;;  %v431_v0 = vpack.c.bf16 %v424_v63, %v417_v62  ;;  %v1390_v3 = vld [vmem:[%s1705_s1 + $0x138] sm:$0xff]   ;;  %v415_v4 = vld [vmem:[%s1557_s22 + $0x20] sm:$0xff]  ;;  %v1393_v8 = vld [vmem:[%s1707_s3 + $0x8] sm:$0xff]  }
  0x1a   : > { %1244 = vmatprep.subr.bf16.mxu1 %v1365_v22  ;;  %v422_v5 = vld [vmem:[%s1557_s22 + $0x58] sm:$0xff]  ;;  %v1392_v7 = vld [vmem:[%s1707_s3] sm:$0xff]   ;;  %v1394_v9 = vld [vmem:[%s1707_s3 + $0x10] sm:$0xff]  }
  0x1b   : > { %1223 = vmatpush3.bf16.msra.mxu0 %v1364_v21  ;;  %v429_v6 = vpack.c.bf16 %v422_v5, %v415_v4  ;;  %v1395_v10 = vld [vmem:[%s1707_s3 + $0x18] sm:$0xff]   ;;  %v1396_v11 = vld [vmem:[%s1707_s3 + $0x20] sm:$0xff]   ;;  %v1397_v12 = vld [vmem:[%s1707_s3 + $0x28] sm:$0xff]  }
  0x1c   : > { %1224 = vmatprep.subr.bf16.mxu0 %v1367_v24  ;;  %v1398_v13 = vld [vmem:[%s1707_s3 + $0x30] sm:$0xff]   ;;  %v1399_v14 = vld [vmem:[%s1707_s3 + $0x38] sm:$0xff]   ;;  %v1400_v15 = vld [vmem:[%s1709_s5] sm:$0xff]  }
  0x1d   : > { %1245 = vmatpush3.bf16.msra.mxu1 %v1366_v23  ;;  %v1401_v16 = vld [vmem:[%s1709_s5 + $0x8] sm:$0xff]   ;;  %v1144_v18 = vld [vmem:[%s1706_s2] ss:$0 sm:$0xff] }
  0x1e   : > { %1246 = vmatprep.subr.bf16.mxu1 %v1369_v26 }
  0x1f   : > { %1225 = vmatpush3.bf16.msra.mxu0 %v1368_v25 }
  0x20   : > { %1226 = vmatprep.subr.bf16.mxu0 %v1371_v28 }
  0x21   : > { %1247 = vmatpush3.bf16.msra.mxu1 %v1370_v27 }
  0x22   : > { %1248 = vmatprep.subr.bf16.mxu1 %v1373_v30 }
  0x23   : > { %1227 = vmatpush3.bf16.msra.mxu0 %v1372_v29 }
  0x24   : > { %1256 = vmatprep.subr.bf16.mxu0 %v1375_v38 }
  0x25   : > { %1249 = vmatpush3.bf16.msra.mxu1 %v1374_v34 }
  0x26   : > { %1294 = vmatprep.subr.bf16.mxu1 %v1412_v43  ;;  %769 = vmatmul.mubr.bf16.vlgmr.msra.gmra.mrb[0].mxu0 %v425_v37 }
  0x27   : > { %1257 = vmatpush3.bf16.msra.mxu0 %v1376_v42  ;;  %850 = vmatprep.mubr.bf16.mxu0 %v430_v61 }
  0x28   : > { %810 = vmatmul.mubr.bf16.vlgmr.msra.gmra.mrb[0].mxu1 %v427_v46  ;;  %1258 = vmatprep.subr.bf16.mxu0 %v1377_v47 }
  0x29   : > { %1296 = vmatprep.mubr.msk.bf16.mxu1 %vm1413_vm0, %v1412_v43  ;;  %1295 = vmatpush3.bf16.msra.mxu1 %v1391_v56 }
  0x2a   : > { %1300 = vmatprep.subr.bf16.mxu1 %v1412_v43 }
  0x2b   : > { %1259 = vmatpush3.bf16.msra.mxu0 %v1378_v48 }
  0x2c   : > { %1260 = vmatprep.subr.bf16.mxu0 %v1379_v49 }
  0x2f   : > { %1261 = vmatpush3.bf16.msra.mxu0 %v1380_v50 }
  0x30   : > { %1262 = vmatprep.subr.bf16.mxu0 %v1381_v51  ;;  %1297 = vmatmul.mubr.msk.bf16.vlgmr.msra.gmra.mrb[4].mxu1 %vm732_vm1, %v431_v0 }
  0x31   : > { %1316 = vmatprep.mubr.msk.bf16.mxu1 %vm1413_vm0, %v1412_v43  ;;  %1301 = vmatpush3.bf16.msra.mxu1 %v1392_v7 }
  0x32   : > { %1302 = vmatprep.subr.bf16.mxu1 %v1412_v43 }
  0x33   : > { %1263 = vmatpush3.bf16.msra.mxu0 %v1382_v52  ;;  %v1402_v52 = vld [vmem:[%s1709_s5 + $0x10] sm:$0xff]  }
  0x34   : > { %1264 = vmatprep.subr.bf16.mxu0 %v1383_v53  ;;  %v1403_v53 = vld [vmem:[%s1709_s5 + $0x18] sm:$0xff]  }
  0x35   : > { %1303 = vmatpush3.bf16.msra.mxu1 %v1393_v8 }
  0x36   : > { %1304 = vmatprep.subr.bf16.mxu1 %v1412_v43 }
  0x37   : > { %1265 = vmatpush3.bf16.msra.mxu0 %v1384_v54  ;;  %v1195_v54 = vld [vmem:[%s1708_s4] ss:$0 sm:$0xff] }
  0x38   : > { %1266 = vmatprep.subr.bf16.mxu0 %v1385_v55 }
  0x39   : > { %1305 = vmatpush3.bf16.msra.mxu1 %v1394_v9 }
  0x3a   : > { %1306 = vmatprep.subr.bf16.mxu1 %v1412_v43 }
  0x3b   : > { %1267 = vmatpush3.bf16.msra.mxu0 %v1386_v58 }
  0x3c   : > { %1268 = vmatprep.subr.bf16.mxu0 %v1387_v59 }
  0x3d   : > { %1307 = vmatpush3.bf16.msra.mxu1 %v1395_v10 }
  0x3e   : > { %1308 = vmatprep.subr.bf16.mxu1 %v1412_v43 }
  0x3f   : > { %1269 = vmatpush3.bf16.msra.mxu0 %v1388_v1 }
  0x40   : > { %1270 = vmatprep.subr.bf16.mxu0 %v1389_v2 }
  0x41   : > { %1309 = vmatpush3.bf16.msra.mxu1 %v1396_v11 }
  0x42   : > { %1310 = vmatprep.subr.bf16.mxu1 %v1412_v43 }
  0x43   : > { %1271 = vmatpush3.bf16.msra.mxu0 %v1390_v3 }
  0x44   : > { %1320 = vmatprep.subr.bf16.mxu0 %v1412_v43 }
  0x45   : > { %1311 = vmatpush3.bf16.msra.mxu1 %v1397_v12 }
  0x46   : > { %851 = vmatmul.mubr.bf16.vlgmr.msra.gmra.mrb[4].mxu0 %v429_v6  ;;  %1312 = vmatprep.subr.bf16.mxu1 %v1412_v43 }
  0x47   : > { %1328 = vmatprep.mubr.msk.bf16.mxu0 %vm1413_vm0, %v1412_v43  ;;  %1321 = vmatpush3.bf16.msra.mxu0 %v1400_v15 }
  0x48   : > { %1322 = vmatprep.subr.bf16.mxu0 %v1412_v43 }
  0x49   : > { %1313 = vmatpush3.bf16.msra.mxu1 %v1398_v13 }
  0x4a   : > { %1314 = vmatprep.subr.bf16.mxu1 %v1412_v43 }
  0x4b   : > { %1323 = vmatpush3.bf16.msra.mxu0 %v1401_v16 }
  0x4c   : > { %1324 = vmatprep.subr.bf16.mxu0 %v1412_v43 }
  0x4d   : > { %1315 = vmatpush3.bf16.msra.mxu1 %v1399_v14 }
  0x4f   : > { %1325 = vmatpush3.bf16.msra.mxu0 %v1402_v52 }
  0x50   : > { %1326 = vmatprep.subr.bf16.mxu0 %v1412_v43  ;;  %v1204_v43 = vld [vmem:[%s1710_s6] ss:$0 sm:$0xff] }
  0x53   : > { %1327 = vmatpush3.bf16.msra.mxu0 %v1403_v53 }
  0xf9   : > { %v1228_v17 = vpop.f32.mrb[0].mxu0 }
  0xfa   : > { %v1229_v19 = vpop.f32.mrb[1].mxu0 }
  0xfb   : > { %v1230_v20 = vadd.f32 %v1229_v19, %v1228_v17  ;;  %v1231_v21 = vpop.f32.mrb[2].mxu0  ;;  %v1250_v22 = vpop.f32.mrb[0].mxu1 }
  0xfc   : > { %v1232_v23 = vpop.f32.mrb[3].mxu0  ;;  %v1251_v26 = vpop.f32.mrb[1].mxu1 }
  0xfd   : > { %v771_v24 = vadd.f32 %v1230_v20, %v1144_v18  ;;  %v1233_v25 = vadd.f32 %v1232_v23, %v1231_v21  ;;  %v1252_v27 = vadd.f32 %v1251_v26, %v1250_v22  ;;  %v1253_v28 = vpop.f32.mrb[2].mxu1 }
  0xfe   : > { %v1254_v30 = vpop.f32.mrb[3].mxu1 }
  0xff   : > { %v774_v29 = vadd.f32 %v1233_v25, %v1144_v18  ;;  %v812_v31 = vadd.f32 %v1252_v27, %v771_v24  ;;  %v1255_v32 = vadd.f32 %v1254_v30, %v1253_v28 }
 0x101   : > { %v815_v33 = vadd.f32 %v1255_v32, %v774_v29 }
 0x103   : > { %v893_v34 = vpop.f32.mrb[4].mxu1 }
 0x104   : > { %v1298_v35 = vpop.f32.mrb[5].mxu1 }
 0x105   : > { %v896_v36 = vpop.f32.mrb[6].mxu1 }
 0x106   : > { %v1299_v37 = vpop.f32.mrb[7].mxu1 }
 0x119   : > { %v1272_v38 = vpop.f32.mrb[4].mxu0 }
 0x11a   : > { %v1273_v39 = vpop.f32.mrb[5].mxu0 }
 0x11b   : > { %v1274_v40 = vadd.f32 %v1273_v39, %v1272_v38  ;;  %v1275_v41 = vpop.f32.mrb[6].mxu0 }
 0x11c   : > { %v1276_v42 = vpop.f32.mrb[7].mxu0 }
 0x11d   : > { %v853_v44 = vadd.f32 %v1274_v40, %v812_v31  ;;  %v1277_v45 = vadd.f32 %v1276_v42, %v1275_v41 }
 0x11f   : > { %v894_v46 = vadd.f32 %v893_v34, %v853_v44  ;;  %v856_v47 = vadd.f32 %v1277_v45, %v815_v33 }
 0x121   : > { %v897_v48 = vadd.f32 %v896_v36, %v856_v47  ;;  %v900_v49 = vmax.f32 %v894_v46, 0.0 }
 0x123   : > { %v901_v50 = vmax.f32 %v897_v48, 0.0 }
 0x125   : > { %v902_v51 = vpack.c.bf16 %v901_v50, %v900_v49 }
 0x127   : > { %1317 = vmatmul.mubr.bf16.vlgmr.msra.gmra.mrb[8].mxu1 %v902_v51 }
 0x1fa   : > { %v991_v55 = vpop.f32.mrb[8].mxu1 }
 0x1fb   : > { %v992_v56 = vadd.f32 %v1195_v54, %v991_v55  ;;  %v1318_v57 = vpop.f32.mrb[9].mxu1 }
 0x1fc   : > { %v994_v58 = vpop.f32.mrb[10].mxu1 }
 0x1fd   : > { %v995_v59 = vadd.f32 %v1195_v54, %v994_v58  ;;  %v1319_v60 = vpop.f32.mrb[11].mxu1  ;;  %v998_v61 = vmax.f32 %v992_v56, 0.0 }
 0x1ff   : > { %v999_v62 = vmax.f32 %v995_v59, 0.0 }
 0x201   : > { %v1000_v63 = vpack.c.bf16 %v999_v62, %v998_v61 }
 0x203   : > { %1329 = vmatmul.mubr.msk.bf16.vlgmr.msra.gmra.mrb[8].mxu0 %vm1031_vm2, %v1000_v63 }
 0x2d6   : > { %v1069_v0 = vpop.f32.mrb[8].mxu0 }
 0x2d7   : > { %v1070_v1 = vadd.f32 %v1204_v43, %v1069_v0  ;;  %v1330_v2 = vpop.f32.mrb[9].mxu0 }
 0x2d8   : > { %v1072_v3 = vpop.f32.mrb[10].mxu0 }
 0x2d9   : > { %1077 = vst.msk [vmem:[%s283_s14] sm:$0xff] %vm1076_vm3, %v1070_v1  ;;  %v1073_v4 = vadd.f32 %v1204_v43, %v1072_v3  ;;  %v1331_v5 = vpop.f32.mrb[11].mxu0 }
 0x2db   : > { %1078 = vst.msk [vmem:[%s283_s14 + $0x8] sm:$0xff] %vm1076_vm3, %v1073_v4 }
 0x2dc PF: > { %s17_s24 = sadd.s32 1, %s1410_s24  }
 0x2dd   : > { %p14_p4 = scmp.ge.s32.totalorder %s17_s24, 4  }
 0x2df   :  { %16 = sbr.rel (!%p14_p4) target bundleno = 1 (0x1), region = 78 }

</bundles_post_ra>
